<compile_context>
chip_gen: v6e
topology: v6e:2x2x1
jax: 0.10.0
libtpu: 0.0.40
codegen_flags: <defaults>
</compile_context>

<pallas_src>
import math
import functools

import jax
import jax.numpy as jnp
from jax.experimental import pallas as pl
from jax.experimental.pallas import tpu as pltpu


# ----------------------------- Pallas kernel -----------------------------

def _eca_kernel(x_ref, w_ref, o_ref, *, k, inv_hw):
    # x_ref: (1, C, HW) VMEM block (one batch element), HW on the lane axis.
    # w_ref: (1, k) f32 in SMEM (the Conv1d(1,1,k) taps).
    # o_ref: (1, C, HW) output block.
    x = x_ref[0].astype(jnp.float32)                       # (C, HW)
    C = x.shape[0]
    p = (k - 1) // 2

    # AdaptiveAvgPool2d(1): per-channel spatial mean (lane reduce -> XLU).
    y = jnp.sum(x, axis=-1, keepdims=True) * inv_hw        # (C, 1)

    # Conv1d(1, 1, k, padding=p, bias=False) over the channel axis, built from
    # the k scalar taps as masked VPU selects (no MXU, no stored band matrix).
    src = jax.lax.broadcasted_iota(jnp.int32, (C, C), 0)   # source channel c'
    dst = jax.lax.broadcasted_iota(jnp.int32, (C, C), 1)   # output channel c
    diff = src - dst + p                                   # tap index j = c' - c + p
    band = jnp.zeros((C, C), jnp.float32)
    for j in range(k):                                     # static unroll, k is tiny (3)
        band = band + jnp.where(diff == j, w_ref[0, j], 0.0)

    # z[0, c] = sum_{c'} y[c'] * w[c' - c + p]  (zero padded at the channel ends)
    z = jnp.sum(y * band, axis=0, keepdims=True)           # (1, C)
    g = jax.nn.sigmoid(z)                                  # (1, C)

    # Put the per-channel gate back on the sublane (channel) axis without a
    # transpose: gcol[c, 0] = sum_{c''} g[0, c''] * (c'' == c)  (lane reduce).
    gcol = jnp.sum(jnp.where(src == dst, g, 0.0), axis=1, keepdims=True)  # (C, 1)

    # x * y.expand_as(x)
    o_ref[0] = (x * gcol).astype(o_ref.dtype)


# ----------------------------- wrapper -----------------------------

def eca_kernel_size(channels):
    k = math.ceil(math.log(channels, 2) / 2 + 0.5)
    if k % 2 == 0:
        k -= 1
    return k


def eca_forward(x_nchw, w1d):
    """x_nchw: (B, C, H, W); w1d: (k,) Conv1d(1,1,k) weight (bias=False)."""
    B, C, H, W = x_nchw.shape
    HW = H * W
    k = int(w1d.shape[0])

    x3 = x_nchw.reshape(B, C, HW)                  # contiguous; HW -> lane axis
    w2 = w1d.reshape(1, k).astype(jnp.float32)

    out3 = pl.pallas_call(
        functools.partial(_eca_kernel, k=k, inv_hw=1.0 / HW),
        out_shape=jax.ShapeDtypeStruct((B, C, HW), x_nchw.dtype),
        grid=(B,),
        in_specs=[
            pl.BlockSpec((1, C, HW), lambda b: (b, 0, 0)),
            pl.BlockSpec(memory_space=pltpu.MemorySpace.SMEM),  # k scalar taps
        ],
        out_specs=pl.BlockSpec((1, C, HW), lambda b: (b, 0, 0)),
        compiler_params=pltpu.CompilerParams(
            dimension_semantics=("parallel",),     # pipelining + v7x megacore
        ),
    )(x3, w2)
    return out3.reshape(B, C, H, W)


# ----------------------------- pure-JAX reference -----------------------------

def eca_reference(x, w):
    B, C, H, W = x.shape
    k = w.shape[0]
    p = (k - 1) // 2
    y = jnp.mean(x, axis=(2, 3))                           # (B, C)
    ypad = jnp.pad(y, ((0, 0), (p, p)))
    z = sum(w[j] * ypad[:, j:j + C] for j in range(k))     # conv1d over channels
    g = jax.nn.sigmoid(z)
    return x * g[:, :, None, None]


if __name__ == "__main__":
    key = jax.random.PRNGKey(0)
    kx, kw = jax.random.split(key)

    # channels=16 -> ECA kernel size k=3 (the canonical case); batch=2, 16x16 spatial.
    B, C, H, W = 2, 16, 16, 16
    x = jax.random.normal(kx, (B, C, H, W), jnp.float32)

    k = eca_kernel_size(C)
    bound = 1.0 / math.sqrt(k)   # matches PyTorch Conv1d default init bound (fan_in = k)
    w = jax.random.uniform(kw, (k,), jnp.float32, minval=-bound, maxval=bound)

    y = jax.jit(eca_forward)(x, w)
    jax.block_until_ready(y)

    y_ref = eca_reference(x, w)
    assert y.shape == (B, C, H, W), y.shape
    assert bool(jnp.all(jnp.isfinite(y)))
    assert bool(jnp.allclose(y, y_ref, atol=1e-5, rtol=1e-5)), \
        float(jnp.max(jnp.abs(y - y_ref)))
    print("KERNEL_OK")
</pallas_src>

<mosaic_0001>
module attributes {stable_mosaic.version = 11 : i64} {
  func.func @_eca_kernel(%arg0: i32, %arg1: memref<1x16x256xf32, #tpu.memory_space<vmem>>, %arg2: memref<1x3xf32, #tpu.memory_space<smem>>, %arg3: memref<1x16x256xf32, #tpu.memory_space<vmem>>) attributes {dimension_semantics = [#tpu.dimension_semantics<parallel>], iteration_bounds = array<i64: 2>, scalar_prefetch = 0 : i64, scratch_operands = 0 : i64, tpu.core_type = #tpu.core_type<tc>, window_params = [{transform_indices = @transform_0, window_bounds = array<i64: 1, 16, 256>}, {transform_indices = @transform_1, window_bounds = array<i64: 1, 3>}, {transform_indices = @transform_2, window_bounds = array<i64: 1, 16, 256>}]} {
    %c0 = arith.constant 0 : index
    %c0_0 = arith.constant 0 : index
    %c0_1 = arith.constant 0 : index
    %0 = vector.load %arg1[%c0, %c0_0, %c0_1] : memref<1x16x256xf32, #tpu.memory_space<vmem>>, vector<1x16x256xf32>
    %1 = vector.shape_cast %0 : vector<1x16x256xf32> to vector<16x256xf32>
    %cst = arith.constant dense<0.000000e+00> : vector<16xf32>
    %2 = vector.multi_reduction <add>, %1, %cst [1] : vector<16x256xf32> to vector<16xf32>
    %3 = vector.shape_cast %2 : vector<16xf32> to vector<16x1xf32>
    %cst_2 = arith.constant 3.906250e-03 : f32
    %4 = vector.broadcast %cst_2 : f32 to vector<16x1xf32>
    %5 = arith.mulf %3, %4 : vector<16x1xf32>
    %6 = tpu.iota {dimensions = array<i32: 0>} : vector<16x16xi32>
    %7 = tpu.iota {dimensions = array<i32: 1>} : vector<16x16xi32>
    %8 = arith.subi %6, %7 : vector<16x16xi32>
    %c1_i32 = arith.constant 1 : i32
    %9 = vector.broadcast %c1_i32 : i32 to vector<16x16xi32>
    %10 = arith.addi %8, %9 : vector<16x16xi32>
    %cst_3 = arith.constant 0.000000e+00 : f32
    %11 = vector.broadcast %cst_3 : f32 to vector<16x16xf32>
    %c0_i32 = arith.constant 0 : i32
    %12 = vector.broadcast %c0_i32 : i32 to vector<16x16xi32>
    %13 = arith.cmpi eq, %10, %12 : vector<16x16xi32>
    %c0_4 = arith.constant 0 : index
    %c0_5 = arith.constant 0 : index
    %14 = memref.load %arg2[%c0_4, %c0_5] : memref<1x3xf32, #tpu.memory_space<smem>>
    %cst_6 = arith.constant 0.000000e+00 : f32
    %15 = vector.broadcast %14 : f32 to vector<16x16xf32>
    %16 = vector.broadcast %cst_6 : f32 to vector<16x16xf32>
    %17 = arith.select %13, %15, %16 : vector<16x16xi1>, vector<16x16xf32>
    %18 = arith.addf %11, %17 : vector<16x16xf32>
    %c1_i32_7 = arith.constant 1 : i32
    %19 = vector.broadcast %c1_i32_7 : i32 to vector<16x16xi32>
    %20 = arith.cmpi eq, %10, %19 : vector<16x16xi32>
    %c0_8 = arith.constant 0 : index
    %c1 = arith.constant 1 : index
    %21 = memref.load %arg2[%c0_8, %c1] : memref<1x3xf32, #tpu.memory_space<smem>>
    %cst_9 = arith.constant 0.000000e+00 : f32
    %22 = vector.broadcast %21 : f32 to vector<16x16xf32>
    %23 = vector.broadcast %cst_9 : f32 to vector<16x16xf32>
    %24 = arith.select %20, %22, %23 : vector<16x16xi1>, vector<16x16xf32>
    %25 = arith.addf %18, %24 : vector<16x16xf32>
    %c2_i32 = arith.constant 2 : i32
    %26 = vector.broadcast %c2_i32 : i32 to vector<16x16xi32>
    %27 = arith.cmpi eq, %10, %26 : vector<16x16xi32>
    %c0_10 = arith.constant 0 : index
    %c2 = arith.constant 2 : index
    %28 = memref.load %arg2[%c0_10, %c2] : memref<1x3xf32, #tpu.memory_space<smem>>
    %cst_11 = arith.constant 0.000000e+00 : f32
    %29 = vector.broadcast %28 : f32 to vector<16x16xf32>
    %30 = vector.broadcast %cst_11 : f32 to vector<16x16xf32>
    %31 = arith.select %27, %29, %30 : vector<16x16xi1>, vector<16x16xf32>
    %32 = arith.addf %25, %31 : vector<16x16xf32>
    %33 = vector.broadcast %5 : vector<16x1xf32> to vector<16x16xf32>
    %34 = arith.mulf %33, %32 : vector<16x16xf32>
    %cst_12 = arith.constant dense<0.000000e+00> : vector<16xf32>
    %35 = vector.multi_reduction <add>, %34, %cst_12 [0] : vector<16x16xf32> to vector<16xf32>
    %36 = vector.shape_cast %35 : vector<16xf32> to vector<1x16xf32>
    %37 = arith.negf %36 : vector<1x16xf32>
    %38 = math.exp %37 : vector<1x16xf32>
    %cst_13 = arith.constant 1.000000e+00 : f32
    %39 = vector.broadcast %cst_13 : f32 to vector<1x16xf32>
    %40 = arith.addf %39, %38 : vector<1x16xf32>
    %41 = arith.divf %39, %40 : vector<1x16xf32>
    %42 = arith.cmpi eq, %6, %7 : vector<16x16xi32>
    %cst_14 = arith.constant 0.000000e+00 : f32
    %43 = vector.shape_cast %41 : vector<1x16xf32> to vector<1x16xf32>
    %44 = vector.broadcast %43 : vector<1x16xf32> to vector<16x16xf32>
    %45 = vector.broadcast %cst_14 : f32 to vector<16x16xf32>
    %46 = arith.select %42, %44, %45 : vector<16x16xi1>, vector<16x16xf32>
    %cst_15 = arith.constant dense<0.000000e+00> : vector<16xf32>
    %47 = vector.multi_reduction <add>, %46, %cst_15 [1] : vector<16x16xf32> to vector<16xf32>
    %48 = vector.shape_cast %47 : vector<16xf32> to vector<16x1xf32>
    %49 = vector.broadcast %48 : vector<16x1xf32> to vector<16x256xf32>
    %50 = arith.mulf %1, %49 : vector<16x256xf32>
    %c0_16 = arith.constant 0 : index
    %c0_17 = arith.constant 0 : index
    %c0_18 = arith.constant 0 : index
    %51 = vector.load %arg3[%c0_16, %c0_17, %c0_18] : memref<1x16x256xf32, #tpu.memory_space<vmem>>, vector<1x16x256xf32>
    %52 = vector.shape_cast %51 : vector<1x16x256xf32> to vector<16x256xf32>
    %53 = vector.shape_cast %50 : vector<16x256xf32> to vector<1x16x256xf32>
    tpu.vector_store %arg3[%c0_16, %c0_17, %c0_18], %53 {strides = array<i32>} : memref<1x16x256xf32, #tpu.memory_space<vmem>>, vector<1x16x256xf32>,
    return
  }
  func.func @transform_0(%arg0: i32) -> (i32, i32, i32) {
    %c0_i32 = arith.constant 0 : i32
    %c0_i32_0 = arith.constant 0 : i32
    %c0_i32_1 = arith.constant 0 : i32
    return %arg0, %c0_i32, %c0_i32_0 : i32, i32, i32
  }
  func.func @transform_1(%arg0: i32) -> (i32, i32) {
    %c0_i32 = arith.constant 0 : i32
    %c0_i32_0 = arith.constant 0 : i32
    %c0_i32_1 = arith.constant 0 : i32
    return %c0_i32, %c0_i32_0 : i32, i32
  }
  func.func @transform_2(%arg0: i32) -> (i32, i32, i32) {
    %c0_i32 = arith.constant 0 : i32
    %c0_i32_0 = arith.constant 0 : i32
    %c0_i32_1 = arith.constant 0 : i32
    return %arg0, %c0_i32, %c0_i32_0 : i32, i32, i32
  }
}

</mosaic_0001>

<bundles_post_ra>
// kernel: eca_forward.1
= control target key start
LH: loop header
LB: loop body
LE: loop exit
PB: predicated region body
PF: predicated region fallthrough
CT: control target
= control target key end

     0   :  { %7 = vsyncpa [#allocation3], 0  ;;  %s390_s9 = smov 0   ;;  %s448_s0 = inlined_call_operand.vmem [shape: f32[2,16,256], index: 0, kind: input, shape index: {}]   ;;  %s449_s1 = inlined_call_operand.vmem [shape: f32[1,3], index: 1, kind: input, shape index: {}]   ;;  %s450_s2 = inlined_call_operand.vmem [shape: f32[2,16,256], index: 2, kind: output, shape index: {}]  }
   0x1 LB: > { %s306_s10 = sadd.s32 4294967295, %s372_s9   ;;  %p308_p0 = scmp.ge.s32.totalorder %s372_s9, 1  ;;  %s372_s9 = sphi %s390_s9, %s13_s9  }
   0x2   : > { %p91_p1 = scmp.lt.s32.totalorder %s372_s9, 3  ;;  %s104_s13 = sshll.u32 %s449_s1, 4  ;;  %s105_s13 = int_to_ptr.vmem [resolvable:$true] %s104_s13 }
   0x3   : > { %p332_p3 = scmp.eq.s32.totalorder %s306_s10, 0  ;;  %s347_s15 = scalar_lea.vmem %s105_s13, 16 }
   0x4   : > { %p401_p2 = pnand %p308_p0, %p91_p1  ;;  %p348_p6 = scmp.ne.s32.totalorder %s105_s13, %s347_s15 }
   0x5   : > { %p355_p10 = scmp.lt.s32.totalorder %s105_s13, %s105_s13  ;;  %p356_p11 = scmp.lt.s32.totalorder %s347_s15, %s347_s15 }
   0x6   : > { %p328_p4 = pneg %p401_p2 }
   0x7   : > { %p357_p12 = por %p356_p11, %p355_p10 }
   0x8   : > { %p329_p5 = pnand %p332_p3, %p328_p4 }
   0xa   : > { %p349_p7 = pneg %p329_p5 }
   0xc   : > { %p350_p8 = pnand %p349_p7, %p348_p6 }
   0xe   : > { %p351_p9 = pneg %p350_p8 }
  0x10   : > { %p358_p13 = pnand %p357_p12, %p351_p9 }
  0x12   : > { %361 = shalt.err (!%p358_p13)
}
  0x13   : > { %s374_s16 = smov [#allocation2]   ;;  %125 = sbr.rel (%p401_p2) target bundleno = 375 (0x177), region = 28 }
  0x14   : > { %331 = dma.vmem_to_smem (!%p329_p5), %s105_s13, 16, %s374_s16, [#allocation3]  }
  0x18   : > { %367 = dma.done.wait (%p332_p3), [#allocation3], 16  }
  0x19   : > { %369 = vsyncadd (%p332_p3), [#allocation3], 4294967280 }
  0x1a   : > { %131 = sfence }
  0x1b   : > { %p148_p0 = scmp.lt.s32.totalorder %s306_s10, 1  ;;  %v170_v6 = vlaneseq  ;;  %s181_s21 = sld [smem:[#allocation2]]  ;;  %vm205_vm6 = vcmask 130048  }
  0x1c   : > { %s317_s22 = sld [smem:[#allocation2 + $0x1]] }
  0x1d   : > { %s453_s10 = smov (!%p148_p0, %s306_s10), 1  ;;  %v171_v7 = vshrl.u32 %v170_v6, 7  ;;  %v174_v8 = vand.u32 127, %v170_v6  ;;  %s318_s23 = sld [smem:[#allocation2 + $0x2]] }
  0x1e   : > { %s322_s17 = sshll.u32 %s453_s10, 5 }
  0x1f   : > { %s152_s20 = scalar_lea.vmem %s448_s0, %s322_s17  ;;  %v172_v9 = vadd.s32 8, %v171_v7  ;;  %v175_v10 = vsub.s32 %v171_v7, %v174_v8  ;;  %vm221_vm7 = vcmp.eq.s32.totalorder %v171_v7, %v174_v8  ;;  %s157_s26 = scalar_lea.vmem %s450_s2, %s322_s17 }
  0x20   : > { %v420_v0 = vld [vmem:[%s152_s20] sm:$0xff]  ;;  %v422_v1 = vld [vmem:[%s152_s20 + $0x8] sm:$0xff]  ;;  %v424_v2 = vld [vmem:[%s152_s20 + $0x10] sm:$0xff] }
  0x21   : > { %v162_v3 = vadd.f32 %v422_v1, %v420_v0  ;;  %v428_v4 = vld [vmem:[%s152_s20 + $0x18] sm:$0xff]  ;;  %v176_v11 = vsub.s32 %v172_v9, %v174_v8  ;;  %v177_v12 = vadd.s32 1, %v175_v10  ;;  %v182_v14 = vstv %s181_s21 }
  0x22   : > { %v165_v5 = vadd.f32 %v428_v4, %v424_v2  ;;  %v190_v15 = vstv %s317_s22  ;;  %vm222_vm8 = vcmp.eq.s32.totalorder %v172_v9, %v174_v8 }
  0x23   : > { %163 = vadd.xlane.f32.xlu0 %v162_v3  ;;  %v178_v13 = vadd.s32 1, %v176_v11  ;;  %vm179_vm0 = vcmp.eq.s32.totalorder %v177_v12, 0  ;;  %vm187_vm1 = vcmp.eq.s32.totalorder %v177_v12, 1  ;;  %vm195_vm4 = vcmp.eq.s32.totalorder %v177_v12, 2 }
  0x24   : > { %v183_v16 = vsel %vm179_vm0, %v182_v14, 0.0  ;;  %v191_v17 = vsel %vm187_vm1, %v190_v15, 0.0  ;;  %v198_v18 = vstv %s318_s23 }
  0x25   : > { %vm180_vm2 = vcmp.eq.s32.totalorder %v178_v13, 0  ;;  %vm188_vm3 = vcmp.eq.s32.totalorder %v178_v13, 1  ;;  %v193_v21 = vadd.f32 %v191_v17, %v183_v16  ;;  %vm196_vm5 = vcmp.eq.s32.totalorder %v178_v13, 2 }
  0x26   : > { %v184_v19 = vsel %vm180_vm2, %v182_v14, 0.0  ;;  %v192_v20 = vsel %vm188_vm3, %v190_v15, 0.0  ;;  %v199_v22 = vsel %vm195_vm4, %v198_v18, 0.0  ;;  %v200_v25 = vsel %vm196_vm5, %v198_v18, 0.0 }
  0x27   : > { %166 = vadd.xlane.f32.xlu0 %v165_v5  ;;  %v194_v23 = vadd.f32 %v192_v20, %v184_v19  ;;  %v201_v26 = vadd.f32 %v199_v22, %v193_v21 }
  0x29   : > { %v202_v28 = vadd.f32 %v200_v25, %v194_v23 }
  0xac   : > { %v164_v24 = vpop.xlane.xlu0 %163 }
  0xad   : > { %v168_v27 = vmul.f32 0.00390625, %v164_v24 }
  0xaf   : > { %v203_v30 = vmul.f32 %v201_v26, %v168_v27 }
  0xb0   : > { %v167_v29 = vpop.xlane.xlu0 %166 }
  0xb1   : > { %v169_v31 = vmul.f32 0.00390625, %v167_v29  ;;  %v206_v33 = vsel %vm205_vm6, %v203_v30, 0.0 }
  0xb3   : > { %v204_v32 = vmul.f32 %v202_v28, %v169_v31 }
  0xb5   : > { %v207_v34 = vsel %vm205_vm6, %v204_v32, 0.0 }
  0xb6   : > { %v208_v35 = vadd.f32 %v207_v34, %v206_v33 }
  0xb8   : > { %v209_v36 = vrot.slane %v208_v35, 4 }
  0xba   : > { %v210_v37 = vadd.f32 %v209_v36, %v208_v35 }
  0xbc   : > { %v211_v38 = vrot.slane %v210_v37, 2 }
  0xbe   : > { %v212_v39 = vadd.f32 %v211_v38, %v210_v37 }
  0xc0   : > { %v213_v40 = vrot.slane %v212_v39, 1 }
  0xc2   : > { %v214_v41 = vadd.f32 %v213_v40, %v212_v39 }
  0xc4   : > { %v319_v42 = vmul.f32 -1.442695, %v214_v41 }
  0xc6   : > { %343 = vpow2.f32 %v319_v42 }
  0xd3   : > { %v344_v43 = vpop.eup %343 }
  0xd4   : > { %v218_v44 = vadd.f32 1.0, %v344_v43 }
  0xd6   : > { %345 = vrcp.f32 %v218_v44 }
  0xe3   : > { %v346_v45 = vpop.eup %345 }
  0xe4   : > { %v223_v46 = vsel %vm221_vm7, %v346_v45, 0.0  ;;  %v224_v48 = vsel %vm222_vm8, %v346_v45, 0.0 }
  0xe5   : > { %v225_v47 = vsel %vm205_vm6, %v223_v46, 0.0  ;;  %v228_v49 = vsel %vm205_vm6, %v224_v48, 0.0 }
  0xe6   : > { %226 = vadd.xlane.f32.xlu1 %v225_v47 }
  0xea   : > { %229 = vadd.xlane.f32.xlu1 %v228_v49 }
 0x16f   : > { %v227_v50 = vpop.xlane.xlu1 %226 }
 0x170   : > { %v231_v51 = vmul.f32 %v227_v50, %v420_v0  ;;  %v232_v52 = vmul.f32 %v227_v50, %v422_v1 }
 0x172   : > { %235 = vst [vmem:[%s157_s26] sm:$0xff] %v231_v51  ;;  %236 = vst [vmem:[%s157_s26 + $0x8] sm:$0xff] %v232_v52 }
 0x173   : > { %v230_v53 = vpop.xlane.xlu1 %229 }
 0x174   : > { %v233_v54 = vmul.f32 %v230_v53, %v424_v2  ;;  %v234_v55 = vmul.f32 %v230_v53, %v428_v4 }
 0x176   : > { %237 = vst [vmem:[%s157_s26 + $0x10] sm:$0xff] %v233_v54  ;;  %238 = vst [vmem:[%s157_s26 + $0x18] sm:$0xff] %v234_v55 }
 0x177 PF: > { %s13_s9 = sadd.s32 1, %s372_s9  }
 0x178   : > { %p10_p1 = scmp.ge.s32.totalorder %s13_s9, 4  }
 0x17a   :  { %12 = sbr.rel (!%p10_p1) target bundleno = 1 (0x1), region = 63 }
 0x17f   :  { %260 = vsyncpa [#allocation3], 1 }
 0x180   :  { %262 = vsyncpa [#allocation3 + $0x1], 1 }

</bundles_post_ra>
